<compile_context>
chip_gen: v5e
topology: v5e:2x2
jax: 0.10.0
libtpu: 0.0.40
codegen_flags: <defaults>
</compile_context>

<pallas_src>
import functools
import math

import jax
import jax.numpy as jnp
from jax.experimental import pallas as pl
from jax.experimental.pallas import tpu as pltpu

_LANES = 128
_SUBLANES = 8
_TM_MAX = 4096  # rows per block -> 2 MiB f32 per input block


def _round_up(x, m):
    return ((x + m - 1) // m) * m


def _sublane_multiple(dtype):
    # (8,128) tile for 32-bit, (16,128) for 16-bit, (32,128) for 8-bit dtypes.
    return max(_SUBLANES, 32 // jnp.dtype(dtype).itemsize)


def _focal_loss_kernel(pred_ref, label_ref, lsum_ref, wsum_ref,
                       loss_acc_ref, w_acc_ref, *,
                       a_pos, a_neg, gamma, eps, ignore_label,
                       tm, m_rows, tiles_per_split, need_mask):
    i = pl.program_id(2)

    @pl.when(i == 0)
    def _():
        loss_acc_ref[...] = jnp.zeros_like(loss_acc_ref)
        w_acc_ref[...] = jnp.zeros_like(w_acc_ref)

    # Hot path: elementwise focal loss on a (tm, 128) tile; native-dtype inputs
    # are cast to f32 in-register.
    label = label_ref[0].astype(jnp.float32)
    x = pred_ref[0].astype(jnp.float32)
    # sigmoid(x) == 0.5*tanh(0.5*x) + 0.5 : transcendental goes to the EUP slot.
    pred = 0.5 * jnp.tanh(0.5 * x) + 0.5

    sw = label != ignore_label
    if need_mask:
        # Fold the ragged-tail row mask directly into sw: garbage label bits in
        # out-of-bounds rows (possibly NaN) must not count as valid samples.
        start = (pl.program_id(1) * tiles_per_split + i) * tm
        rows = jax.lax.broadcasted_iota(jnp.int32, (tm, _LANES), 0)
        sw = sw & ((start + rows) < m_rows)
    sw_f = sw.astype(jnp.float32)

    one_hot = label > 0.5
    # a_pos = -alpha*weight, a_neg = -(1-alpha)*weight : sign, class weight and
    # sample weight are all carried by alpha_t (one select + one mul).
    alpha_t = jnp.where(one_hot, a_pos, a_neg) * sw_f
    pt = jnp.where(sw, 1.0 - jnp.abs(label - pred), 1.0)
    one_minus_pt = 1.0 - pt
    if float(gamma).is_integer():
        beta = one_minus_pt ** int(gamma)          # lax.integer_pow: pure VPU
    else:
        beta = one_minus_pt ** float(gamma)
    loss = alpha_t * beta * jnp.log(jnp.minimum(pt + eps, 1.0))

    # Fold the (tm,128) tile into the resident (8,128) partials: the reshape is
    # (8,128)-tile aligned and the axis-0 sum is vreg-wise VALU adds (no XLU).
    loss_acc_ref[...] += loss.reshape(tm // _SUBLANES, _SUBLANES, _LANES).sum(axis=0)
    w_acc_ref[...] += sw_f.reshape(tm // _SUBLANES, _SUBLANES, _LANES).sum(axis=0)

    @pl.when(i == pl.num_programs(2) - 1)
    def _():
        lsum = jnp.sum(loss_acc_ref[...], keepdims=True)   # (1, 1) — tiny XLU
        wsum = jnp.sum(w_acc_ref[...], keepdims=True)      # (1, 1)
        lsum_ref[...] = lsum.reshape(1, 1, 1, 1).astype(lsum_ref.dtype)
        wsum_ref[...] = wsum.reshape(1, 1, 1, 1).astype(wsum_ref.dtype)


def focal_loss(pred, label, *, alpha=0.25, gamma=2, eps=1e-9, weight=1.0,
               scale=1.0, ignore_label=-1, size_average=True, tm_max=_TM_MAX):
    """Per-batch focal loss; returns float32 of shape (batch,)."""
    assert pred.shape == label.shape, "pred and label must have identical shapes"
    batch = pred.shape[0]
    n = math.prod(pred.shape[1:])

    pred2 = pred.reshape(batch, n)
    label2 = label.reshape(batch, n)
    if n % _LANES != 0:
        # Minimal pad to a multiple of 128 lanes; label padded with ignore_label
        # so the padded tail has sample_weight == 0.
        pad = _LANES - n % _LANES
        pred2 = jnp.pad(pred2, ((0, 0), (0, pad)))
        label2 = jnp.pad(label2, ((0, 0), (0, pad)), constant_values=ignore_label)
    m_rows = pred2.shape[1] // _LANES
    pred3 = pred2.reshape(batch, m_rows, _LANES)
    label3 = label2.reshape(batch, m_rows, _LANES)

    sub = max(_sublane_multiple(pred3.dtype), _sublane_multiple(label3.dtype))
    tm = min(_round_up(tm_max, sub), _round_up(m_rows, sub))
    total_tiles = -(-m_rows // tm)
    # Give both v7x TensorCores work when batch alone can't: split the row axis.
    n_splits = 2 if (batch < 2 and total_tiles >= 2) else 1
    tiles_per_split = -(-total_tiles // n_splits)
    need_mask = (n_splits * tiles_per_split * tm) != m_rows
    last_blk = total_tiles - 1

    kernel = functools.partial(
        _focal_loss_kernel,
        a_pos=-float(alpha) * float(weight),
        a_neg=-(1.0 - float(alpha)) * float(weight),
        gamma=gamma, eps=float(eps), ignore_label=float(ignore_label),
        tm=tm, m_rows=m_rows, tiles_per_split=tiles_per_split,
        need_mask=bool(need_mask))

    def in_map(b, s, i):
        # Clamp so fully-OOB blocks (odd tile counts under the split) re-read a
        # valid block; the in-kernel row mask zeroes their contribution anyway.
        blk = jnp.minimum(s * tiles_per_split + i, last_blk)
        return (b, blk, 0)

    def out_map(b, s, i):
        return (b, s, 0, 0)

    in_block_bytes = tm * _LANES * (pred3.dtype.itemsize + label3.dtype.itemsize)
    # 2 inputs x 2 pipeline buffers + headroom; >= 16 MiB, capped at 32 MiB so a
    # v6e-sized budget is never blindly reused on v7x (64 MiB physical VMEM).
    vmem_limit = int(min(32 << 20, max(16 << 20, 4 * in_block_bytes)))

    lsum, wsum = pl.pallas_call(
        kernel,
        out_shape=(jax.ShapeDtypeStruct((batch, n_splits, 1, 1), jnp.float32),
                   jax.ShapeDtypeStruct((batch, n_splits, 1, 1), jnp.float32)),
        grid_spec=pltpu.PrefetchScalarGridSpec(
            num_scalar_prefetch=0,
            grid=(batch, n_splits, tiles_per_split),
            in_specs=[
                pl.BlockSpec((1, tm, _LANES), in_map),
                pl.BlockSpec((1, tm, _LANES), in_map),
            ],
            out_specs=[
                pl.BlockSpec((1, 1, 1, 1), out_map),
                pl.BlockSpec((1, 1, 1, 1), out_map),
            ],
            scratch_shapes=[
                pltpu.VMEM((_SUBLANES, _LANES), jnp.float32),
                pltpu.VMEM((_SUBLANES, _LANES), jnp.float32),
            ],
        ),
        compiler_params=pltpu.CompilerParams(
            dimension_semantics=("parallel", "parallel", "arbitrary"),
            vmem_limit_bytes=vmem_limit,
        ),
    )(pred3, label3)

    # Tiny per-batch combine of the per-split partials (<= 2 values each).
    loss_sum = lsum.reshape(batch, n_splits).sum(axis=1)
    if size_average:
        w_sum = wsum.reshape(batch, n_splits).sum(axis=1)
        return (float(scale) * loss_sum / (w_sum + float(eps))).astype(jnp.float32)
    return (float(scale) * loss_sum).astype(jnp.float32)


def _reference(pred, label, *, alpha=0.25, gamma=2, eps=1e-9, weight=1.0,
               scale=1.0, ignore_label=-1, size_average=True):
    lab = label.astype(jnp.float32)
    one_hot = lab > 0.5
    sw = lab != ignore_label
    sw_f = sw.astype(jnp.float32)
    p = jax.nn.sigmoid(pred.astype(jnp.float32))
    alpha_t = jnp.where(one_hot, alpha * sw_f, (1.0 - alpha) * sw_f)
    pt = jnp.where(sw, 1.0 - jnp.abs(lab - p), jnp.ones_like(p))
    beta = (1.0 - pt) ** gamma
    loss = -alpha_t * beta * jnp.log(jnp.minimum(pt + eps, 1.0))
    loss = weight * (loss * sw_f)
    axes = tuple(range(1, label.ndim))
    if size_average:
        tsum = jnp.sum(sw_f, axis=axes)
        loss = jnp.sum(loss, axis=axes) / (tsum + eps)
    else:
        loss = jnp.sum(loss, axis=axes)
    return scale * loss


def _make_inputs(key, shape):
    k1, k2, k3 = jax.random.split(key, 3)
    pred = jax.random.normal(k1, shape, dtype=jnp.float32)
    label = (jax.random.uniform(k2, shape) > 0.5).astype(jnp.float32)
    ignore_mask = jax.random.uniform(k3, shape) < 0.1
    label = jnp.where(ignore_mask, -1.0, label)
    return pred, label


if __name__ == "__main__":
    key = jax.random.PRNGKey(0)
    k_a, k_b, k_c = jax.random.split(key, 3)

    # Main case: NCHW segmentation-style input, n % 128 == 0 (no wrapper pad).
    pred, label = _make_inputs(k_a, (2, 4, 16, 16))
    out = jax.block_until_ready(focal_loss(pred, label))
    ref = _reference(pred, label)
    assert out.shape == (2,), out.shape
    assert jnp.allclose(out, ref, rtol=1e-5, atol=5e-6), (out, ref)

    # Ragged case: n not a multiple of 128*tm -> exercises the in-kernel mask.
    pred_r, label_r = _make_inputs(k_b, (1, 3, 20, 20))
    out_r = jax.block_until_ready(focal_loss(pred_r, label_r))
    ref_r = _reference(pred_r, label_r)
    assert jnp.allclose(out_r, ref_r, rtol=1e-5, atol=5e-6), (out_r, ref_r)

    # batch==1 split path (small tm_max forces multiple tiles and 2 splits).
    pred_s, label_s = _make_inputs(k_c, (1, 4, 32, 32))
    out_s = jax.block_until_ready(focal_loss(pred_s, label_s, tm_max=8))
    ref_s = _reference(pred_s, label_s)
    assert jnp.allclose(out_s, ref_s, rtol=1e-5, atol=5e-6), (out_s, ref_s)

    print("KERNEL_OK")
</pallas_src>

<mosaic_0001>
module attributes {stable_mosaic.version = 11 : i64} {
  func.func @_focal_loss_kernel(%arg0: i32, %arg1: i32, %arg2: i32, %arg3: memref<1x8x128xf32, #tpu.memory_space<vmem>>, %arg4: memref<1x8x128xf32, #tpu.memory_space<vmem>>, %arg5: memref<1x1x1x1xf32, #tpu.memory_space<vmem>>, %arg6: memref<1x1x1x1xf32, #tpu.memory_space<vmem>>, %arg7: memref<8x128xf32, #tpu.memory_space<vmem>>, %arg8: memref<8x128xf32, #tpu.memory_space<vmem>>) attributes {dimension_semantics = [#tpu.dimension_semantics<parallel>, #tpu.dimension_semantics<parallel>, #tpu.dimension_semantics<arbitrary>], iteration_bounds = array<i64: 2, 1, 1>, scalar_prefetch = 0 : i64, scratch_operands = 2 : i64, tpu.core_type = #tpu.core_type<tc>, window_params = [{transform_indices = @transform_0, window_bounds = array<i64: 1, 8, 128>}, {transform_indices = @transform_1, window_bounds = array<i64: 1, 8, 128>}, {transform_indices = @transform_2, window_bounds = array<i64: 1, 1, 1, 1>}, {transform_indices = @transform_3, window_bounds = array<i64: 1, 1, 1, 1>}]} {
    %c0_i32 = arith.constant 0 : i32
    %0 = arith.cmpi eq, %arg2, %c0_i32 : i32
    %1 = arith.extui %0 : i1 to i32
    %c0_i32_0 = arith.constant 0 : i32
    %2 = arith.cmpi ne, %1, %c0_i32_0 : i32
    scf.if %2 {
      %cst_29 = arith.constant 0.000000e+00 : f32
      %53 = vector.broadcast %cst_29 : f32 to vector<8x128xf32>
      %c0_30 = arith.constant 0 : index
      %c0_31 = arith.constant 0 : index
      %54 = vector.load %arg7[%c0_30, %c0_31] : memref<8x128xf32, #tpu.memory_space<vmem>>, vector<8x128xf32>
      tpu.vector_store %arg7[%c0_30, %c0_31], %53 {strides = array<i32>} : memref<8x128xf32, #tpu.memory_space<vmem>>, vector<8x128xf32>,
      %cst_32 = arith.constant 0.000000e+00 : f32
      %55 = vector.broadcast %cst_32 : f32 to vector<8x128xf32>
      %c0_33 = arith.constant 0 : index
      %c0_34 = arith.constant 0 : index
      %56 = vector.load %arg8[%c0_33, %c0_34] : memref<8x128xf32, #tpu.memory_space<vmem>>, vector<8x128xf32>
      tpu.vector_store %arg8[%c0_33, %c0_34], %55 {strides = array<i32>} : memref<8x128xf32, #tpu.memory_space<vmem>>, vector<8x128xf32>,
    } else {
    }
    %c0 = arith.constant 0 : index
    %c0_1 = arith.constant 0 : index
    %c0_2 = arith.constant 0 : index
    %3 = vector.load %arg4[%c0, %c0_1, %c0_2] : memref<1x8x128xf32, #tpu.memory_space<vmem>>, vector<1x8x128xf32>
    %4 = vector.shape_cast %3 : vector<1x8x128xf32> to vector<8x128xf32>
    %c0_3 = arith.constant 0 : index
    %c0_4 = arith.constant 0 : index
    %c0_5 = arith.constant 0 : index
    %5 = vector.load %arg3[%c0_3, %c0_4, %c0_5] : memref<1x8x128xf32, #tpu.memory_space<vmem>>, vector<1x8x128xf32>
    %6 = vector.shape_cast %5 : vector<1x8x128xf32> to vector<8x128xf32>
    %cst = arith.constant 5.000000e-01 : f32
    %7 = vector.broadcast %cst : f32 to vector<8x128xf32>
    %8 = arith.mulf %7, %6 : vector<8x128xf32>
    %9 = math.tanh %8 : vector<8x128xf32>
    %cst_6 = arith.constant 5.000000e-01 : f32
    %10 = vector.broadcast %cst_6 : f32 to vector<8x128xf32>
    %11 = arith.mulf %10, %9 : vector<8x128xf32>
    %cst_7 = arith.constant 5.000000e-01 : f32
    %12 = vector.broadcast %cst_7 : f32 to vector<8x128xf32>
    %13 = arith.addf %11, %12 : vector<8x128xf32>
    %cst_8 = arith.constant -1.000000e+00 : f32
    %14 = vector.broadcast %cst_8 : f32 to vector<8x128xf32>
    %15 = arith.cmpf one, %4, %14 : vector<8x128xf32>
    %16 = arith.extui %15 : vector<8x128xi1> to vector<8x128xi32>
    %17 = arith.sitofp %16 : vector<8x128xi32> to vector<8x128xf32>
    %cst_9 = arith.constant 5.000000e-01 : f32
    %18 = vector.broadcast %cst_9 : f32 to vector<8x128xf32>
    %19 = arith.cmpf ogt, %4, %18 : vector<8x128xf32>
    %cst_10 = arith.constant -2.500000e-01 : f32
    %cst_11 = arith.constant -7.500000e-01 : f32
    %20 = vector.broadcast %cst_10 : f32 to vector<8x128xf32>
    %21 = vector.broadcast %cst_11 : f32 to vector<8x128xf32>
    %22 = arith.select %19, %20, %21 : vector<8x128xi1>, vector<8x128xf32>
    %23 = arith.mulf %22, %17 : vector<8x128xf32>
    %24 = arith.subf %4, %13 : vector<8x128xf32>
    %25 = math.absf %24 : vector<8x128xf32>
    %cst_12 = arith.constant 1.000000e+00 : f32
    %26 = vector.broadcast %cst_12 : f32 to vector<8x128xf32>
    %27 = arith.subf %26, %25 : vector<8x128xf32>
    %cst_13 = arith.constant 1.000000e+00 : f32
    %28 = vector.broadcast %cst_13 : f32 to vector<8x128xf32>
    %29 = arith.select %15, %27, %28 : vector<8x128xi1>, vector<8x128xf32>
    %cst_14 = arith.constant 1.000000e+00 : f32
    %30 = vector.broadcast %cst_14 : f32 to vector<8x128xf32>
    %31 = arith.subf %30, %29 : vector<8x128xf32>
    %32 = arith.mulf %31, %31 : vector<8x128xf32>
    %33 = arith.mulf %23, %32 : vector<8x128xf32>
    %cst_15 = arith.constant 9.99999971E-10 : f32
    %34 = vector.broadcast %cst_15 : f32 to vector<8x128xf32>
    %35 = arith.addf %29, %34 : vector<8x128xf32>
    %cst_16 = arith.constant 1.000000e+00 : f32
    %36 = vector.broadcast %cst_16 : f32 to vector<8x128xf32>
    %37 = arith.minimumf %35, %36 : vector<8x128xf32>
    %38 = math.log %37 : vector<8x128xf32>
    %39 = arith.mulf %33, %38 : vector<8x128xf32>
    %c0_17 = arith.constant 0 : index
    %c0_18 = arith.constant 0 : index
    %40 = vector.load %arg7[%c0_17, %c0_18] : memref<8x128xf32, #tpu.memory_space<vmem>>, vector<8x128xf32>
    %41 = vector.shape_cast %39 : vector<8x128xf32> to vector<1x8x128xf32>
    %cst_19 = arith.constant dense<0.000000e+00> : vector<8x128xf32>
    %42 = vector.multi_reduction <add>, %41, %cst_19 [0] : vector<1x8x128xf32> to vector<8x128xf32>
    %43 = arith.addf %40, %42 : vector<8x128xf32>
    %c0_20 = arith.constant 0 : index
    %c0_21 = arith.constant 0 : index
    %44 = vector.load %arg7[%c0_20, %c0_21] : memref<8x128xf32, #tpu.memory_space<vmem>>, vector<8x128xf32>
    tpu.vector_store %arg7[%c0_20, %c0_21], %43 {strides = array<i32>} : memref<8x128xf32, #tpu.memory_space<vmem>>, vector<8x128xf32>,
    %c0_22 = arith.constant 0 : index
    %c0_23 = arith.constant 0 : index
    %45 = vector.load %arg8[%c0_22, %c0_23] : memref<8x128xf32, #tpu.memory_space<vmem>>, vector<8x128xf32>
    %46 = vector.shape_cast %17 : vector<8x128xf32> to vector<1x8x128xf32>
    %cst_24 = arith.constant dense<0.000000e+00> : vector<8x128xf32>
    %47 = vector.multi_reduction <add>, %46, %cst_24 [0] : vector<1x8x128xf32> to vector<8x128xf32>
    %48 = arith.addf %45, %47 : vector<8x128xf32>
    %c0_25 = arith.constant 0 : index
    %c0_26 = arith.constant 0 : index
    %49 = vector.load %arg8[%c0_25, %c0_26] : memref<8x128xf32, #tpu.memory_space<vmem>>, vector<8x128xf32>
    tpu.vector_store %arg8[%c0_25, %c0_26], %48 {strides = array<i32>} : memref<8x128xf32, #tpu.memory_space<vmem>>, vector<8x128xf32>,
    %c0_i32_27 = arith.constant 0 : i32
    %50 = arith.cmpi eq, %arg2, %c0_i32_27 : i32
    %51 = arith.extui %50 : i1 to i32
    %c0_i32_28 = arith.constant 0 : i32
    %52 = arith.cmpi ne, %51, %c0_i32_28 : i32
    scf.if %52 {
      %c0_29 = arith.constant 0 : index
      %c0_30 = arith.constant 0 : index
      %53 = vector.load %arg7[%c0_29, %c0_30] : memref<8x128xf32, #tpu.memory_space<vmem>>, vector<8x128xf32>
      %54 = vector.shape_cast %53 : vector<8x128xf32> to vector<1x8x128xf32>
      %cst_31 = arith.constant dense<0.000000e+00> : vector<1xf32>
      %55 = vector.multi_reduction <add>, %54, %cst_31 [1, 2] : vector<1x8x128xf32> to vector<1xf32>
      %56 = vector.shape_cast %55 : vector<1xf32> to vector<1x1x1xf32>
      %57 = vector.extract %56[0, 0, 0] : f32 from vector<1x1x1xf32>
      %58 = vector.broadcast %57 : f32 to vector<1x1xf32>
      %c0_32 = arith.constant 0 : index
      %c0_33 = arith.constant 0 : index
      %59 = vector.load %arg8[%c0_32, %c0_33] : memref<8x128xf32, #tpu.memory_space<vmem>>, vector<8x128xf32>
      %60 = vector.shape_cast %59 : vector<8x128xf32> to vector<1x8x128xf32>
      %cst_34 = arith.constant dense<0.000000e+00> : vector<1xf32>
      %61 = vector.multi_reduction <add>, %60, %cst_34 [1, 2] : vector<1x8x128xf32> to vector<1xf32>
      %62 = vector.shape_cast %61 : vector<1xf32> to vector<1x1x1xf32>
      %63 = vector.extract %62[0, 0, 0] : f32 from vector<1x1x1xf32>
      %64 = vector.broadcast %63 : f32 to vector<1x1xf32>
      %65 = vector.shape_cast %58 : vector<1x1xf32> to vector<1x1x1x1xf32>
      %c0_35 = arith.constant 0 : index
      %c0_36 = arith.constant 0 : index
      %c0_37 = arith.constant 0 : index
      %c0_38 = arith.constant 0 : index
      %66 = vector.load %arg5[%c0_35, %c0_36, %c0_37, %c0_38] : memref<1x1x1x1xf32, #tpu.memory_space<vmem>>, vector<1x1x1x1xf32>
      tpu.vector_store %arg5[%c0_35, %c0_36, %c0_37, %c0_38], %65 {strides = array<i32>} : memref<1x1x1x1xf32, #tpu.memory_space<vmem>>, vector<1x1x1x1xf32>,
      %67 = vector.shape_cast %64 : vector<1x1xf32> to vector<1x1x1x1xf32>
      %c0_39 = arith.constant 0 : index
      %c0_40 = arith.constant 0 : index
      %c0_41 = arith.constant 0 : index
      %c0_42 = arith.constant 0 : index
      %68 = vector.load %arg6[%c0_39, %c0_40, %c0_41, %c0_42] : memref<1x1x1x1xf32, #tpu.memory_space<vmem>>, vector<1x1x1x1xf32>
      tpu.vector_store %arg6[%c0_39, %c0_40, %c0_41, %c0_42], %67 {strides = array<i32>} : memref<1x1x1x1xf32, #tpu.memory_space<vmem>>, vector<1x1x1x1xf32>,
    } else {
    }
    return
  }
  func.func @transform_0(%arg0: i32, %arg1: i32, %arg2: i32) -> (i32, i32, i32) {
    %c1_i32 = arith.constant 1 : i32
    %0 = arith.muli %arg1, %c1_i32 : i32
    %1 = arith.addi %0, %arg2 : i32
    %c0_i32 = arith.constant 0 : i32
    %2 = arith.minsi %1, %c0_i32 : i32
    %c0_i32_0 = arith.constant 0 : i32
    %c0_i32_1 = arith.constant 0 : i32
    return %arg0, %2, %c0_i32_0 : i32, i32, i32
  }
  func.func @transform_1(%arg0: i32, %arg1: i32, %arg2: i32) -> (i32, i32, i32) {
    %c1_i32 = arith.constant 1 : i32
    %0 = arith.muli %arg1, %c1_i32 : i32
    %1 = arith.addi %0, %arg2 : i32
    %c0_i32 = arith.constant 0 : i32
    %2 = arith.minsi %1, %c0_i32 : i32
    %c0_i32_0 = arith.constant 0 : i32
    %c0_i32_1 = arith.constant 0 : i32
    return %arg0, %2, %c0_i32_0 : i32, i32, i32
  }
  func.func @transform_2(%arg0: i32, %arg1: i32, %arg2: i32) -> (i32, i32, i32, i32) {
    %c0_i32 = arith.constant 0 : i32
    %c0_i32_0 = arith.constant 0 : i32
    %c0_i32_1 = arith.constant 0 : i32
    return %arg0, %arg1, %c0_i32, %c0_i32_0 : i32, i32, i32, i32
  }
  func.func @transform_3(%arg0: i32, %arg1: i32, %arg2: i32) -> (i32, i32, i32, i32) {
    %c0_i32 = arith.constant 0 : i32
    %c0_i32_0 = arith.constant 0 : i32
    %c0_i32_1 = arith.constant 0 : i32
    return %arg0, %arg1, %c0_i32, %c0_i32_0 : i32, i32, i32, i32
  }
}

</mosaic_0001>

<bundles_post_ra>
// kernel: tpu_custom_call.1
= control target key start
LH: loop header
LB: loop body
LE: loop exit
PB: predicated region body
PF: predicated region fallthrough
CT: control target
= control target key end

     0   :  { %9 = vsyncpa [#allocation5], 0  ;;  %s825_s0 = inlined_call_operand.hbm [shape: f32[2,8,128], index: 0, kind: input, shape index: {}]   ;;  %s826_s1 = inlined_call_operand.hbm [shape: f32[2,8,128], index: 1, kind: input, shape index: {}]   ;;  %s827_s2 = inlined_call_operand.vmem [shape: f32[2,1,1,1], index: 2, kind: output, shape index: {0}]   ;;  %s828_s3 = inlined_call_operand.vmem [shape: f32[2,1,1,1], index: 3, kind: output, shape index: {1}]  }
   0x1   :  { %11 = vsyncpa [#allocation5 + $0x1], 0 }
   0x2   :  { %12 = vsyncpa [#allocation7], 0 }
   0x3   :  { %14 = vsyncpa [#allocation7 + $0x1], 0  ;;  %s727_s12 = smov 0   ;;  %s729_s13 = smov 0  }
   0x4   :  { %s731_s14 = smov 0   ;;  %s733_s15 = smov 0  }
   0x5   :  { %s735_s16 = smov 0   ;;  %s737_s17 = smov 0  }
   0x6 LB: > { %s505_s18 = sadd.s32 4294967295, %s703_s17   ;;  %s39_s19 = sadd.s32 1, %s699_s16  ;;  %s703_s17 = sphi %s737_s17, %s20_s17   ;;  %s699_s16 = sphi %s735_s16, %s835_s16   ;;  %s695_s15 = sphi %s733_s15, %s834_s15   ;;  %s691_s14 = sphi %s731_s14, %s833_s14   ;;  %s687_s13 = sphi %s729_s13, %s832_s13   ;;  %s683_s12 = sphi %s727_s12, %s831_s12  }
   0x7   : > { %p41_p0 = scmp.ge.s32.totalorder %s39_s19, 2  ;;  %s54_s20 = sadd.s32 1, %s691_s14 }
   0x8   : > { %p61_p1 = scmp.ne.s32.totalorder %s691_s14, %s687_s13  ;;  %p62_p2 = scmp.eq.s32.totalorder %s703_s17, 0 }
   0x9   : > { %s837_s19 = smov (%p41_p0, %s39_s19), 0  ;;  %p67_p4 = scmp.ne.s32.totalorder %s687_s13, %s683_s12 }
   0xa   : > { %p763_p3 = por %p62_p2, %p61_p1  ;;  %s49_s22 = ssub.s32 %s699_s16, %s837_s19 }
   0xb   : > { %p68_p5 = scmp.eq.s32.totalorder %s505_s18, 0  ;;  %p52_p6 = scmp.eq.s32.totalorder %s49_s22, 0 }
   0xc   : > { %p534_p8 = scmp.lt.s32.totalorder %s703_s17, 2  ;;  %s181_s25 = sand.u32 1, %s691_s14  }
   0xd   : > { %p770_p7 = por %p68_p5, %p67_p4  ;;  %s510_s26 = sshll.u32 %s699_s16, 3 }
   0xe   : > { %s776_s24 = scalar_select %p52_p6, %s691_s14, %s54_s20  }
   0xf   : > { %s509_s27 = sshll.u32 %s181_s25, 3  ;;  %s193_s30 = scalar_lea.hbm %s825_s0, %s510_s26 }
  0x10   : > { %s195_s4 = sshll.u32 %s193_s30, 4  ;;  %s185_s5 = scalar_lea.vmem [#allocation4], %s509_s27  ;;  %s196_s4 = int_to_ptr.hbm [resolvable:$true] %s195_s4 }
  0x11   : > { %s197_s6 = sshll.u32 %s185_s5, 4  ;;  %p528_p9 = pnand %p534_p8, %p763_p3  ;;  %s198_s6 = int_to_ptr.vmem [resolvable:$true] %s197_s6 }
  0x12   : > { %p513_p10 = scmp.ge.s32.totalorder %s703_s17, 1  ;;  %p225_p11 = scmp.lt.s32.totalorder %s703_s17, 3 }
  0x13   : > { %s182_s7 = scalar_lea.sflag [#allocation5], %s181_s25  ;;  %s216_s10 = scalar_lea.hbm %s826_s1, %s510_s26 }
  0x14   : > { %530 = dma.hbm_to_vmem [thread:$0]  (!%p528_p9), %s196_s4, 128, %s198_s6, %s182_s7  }
  0x15   : > { %p226_p12 = pnand %p513_p10, %p225_p11  ;;  %s218_s11 = sshll.u32 %s216_s10, 4  ;;  %s219_s11 = int_to_ptr.hbm [resolvable:$true] %s218_s11 }
  0x16   : > { %s208_s12 = scalar_lea.vmem [#allocation6], %s509_s27  ;;  %s205_s20 = scalar_lea.sflag [#allocation7], %s181_s25 }
  0x17   : > { %s220_s18 = sshll.u32 %s208_s12, 4  ;;  %229 = sbr.rel (%p226_p12) target bundleno = 255 (0xff), region = 28  ;;  %s221_s18 = int_to_ptr.vmem [resolvable:$true] %s220_s18 }
  0x18   : > { %533 = dma.hbm_to_vmem [thread:$0]  (!%p528_p9), %s219_s11, 128, %s221_s18, %s205_s20  }
  0x19   : > { %s231_s21 = sand.u32 (!%p226_p12), 1, %s687_s13  }
  0x1a   : > { %s514_s22 = sshll.u32 (!%p226_p12), %s231_s21, 3  ;;  %s232_s28 = scalar_lea.sflag (!%p226_p12), [#allocation5], %s231_s21 }
  0x1b   : > { %s235_s29 = scalar_lea.vmem (!%p226_p12), [#allocation4], %s514_s22 }
  0x1c   : > { %674 = dma.done.wait (%p770_p7), %s232_s28, 128  }
  0x1d   : > { %676 = vsyncadd (%p770_p7), %s232_s28, 4294967168  ;;  %s242_s26 = scalar_lea.sflag [#allocation7], %s231_s21  ;;  %s245_s27 = scalar_lea.vmem [#allocation6], %s514_s22 }
  0x1e   : > { %678 = dma.done.wait (%p770_p7), %s242_s26, 128  }
  0x1f   : > { %680 = vsyncadd (%p770_p7), %s242_s26, 4294967168  ;;  %v306_v0 = vld [vmem:[%s235_s29] sm:$0xff]  ;;  %v305_v4 = vld [vmem:[%s245_s27] sm:$0xff]  ;;  %v705_v12 = vmov 0.0   ;;  %v706_v14 = vmov -0.75   ;;  %p287_p13 = scmp.lt.s32.totalorder %s695_s15, 1 }
  0x20   : > { %v307_v1 = vmul.f32 0.5, %v306_v0  ;;  %vm311_vm0 = vcmp.ne.f32.partialorder %v305_v4, -1.0  ;;  %vm314_vm1 = vcmp.gt.f32.partialorder %v305_v4, 0.5  ;;  %vm361_vm2 = vcmask 0  }
  0x21   : > { %v516_v13 = vsel %vm311_vm0, 1.0, %v705_v12  ;;  %v315_v15 = vsel %vm314_vm1, -0.25, %v706_v14  ;;  %s839_s15 = smov (!%p287_p13, %s695_s15), 1 }
  0x22   : > { %585 = vtanh.f32 %v307_v1  ;;  %v316_v17 = vmul.f32 %v516_v13, %v315_v15  ;;  %s292_s30 = scalar_lea.vmem %s827_s2, %s839_s15  ;;  %s298_s7 = scalar_lea.vmem %s828_s3, %s839_s15 }
  0x28   : > { %v586_v2 = vpop.eup %585 }
  0x29   : > { %v309_v3 = vmul.f32 0.5, %v586_v2 }
  0x2b   : > { %v310_v5 = vadd.f32 0.5, %v309_v3 }
  0x2d   : > { %v317_v6 = vsub.f32 %v305_v4, %v310_v5 }
  0x2f   : > { %v318_v7 = vand.u32 2147483647, %v317_v6 }
  0x31   : > { %v319_v8 = vsub.f32 1.0, %v318_v7 }
  0x33   : > { %v320_v9 = vsel %vm311_vm0, %v319_v8, 1.0 }
  0x34   : > { %v324_v10 = vadd.f32 1e-09, %v320_v9  ;;  %v321_v11 = vsub.f32 1.0, %v320_v9 }
  0x36   : > { %v325_v16 = vmin.f32 %v324_v10, 1.0  ;;  %v322_v18 = vmul.f32 %v321_v11, %v321_v11 }
  0x38   : > { %587 = vlog2.f32 %v325_v16  ;;  %v323_v19 = vmul.f32 %v322_v18, %v316_v17 }
  0x3e   : > { %v588_v20 = vpop.eup %587 }
  0x3f   : > { %v327_v21 = vmul.f32 0.6931472, %v588_v20 }
  0x41   : > { %v328_v22 = vmul.f32 %v327_v21, %v323_v19 }
  0x43   : > { %341 = vadd.xlane.f32.xlu0 %v328_v22 }
  0x4b   : > { %351 = vadd.xlane.f32.xlu0 %v516_v13 }
  0xb6   : > { %v342_v23 = vpop.xlane.xlu0 %341 }
  0xb7   : > { %v343_v24 = vrot.slane %v342_v23, 4 }
  0xb9   : > { %v344_v25 = vadd.f32 %v343_v24, %v342_v23 }
  0xbb   : > { %v345_v26 = vrot.slane %v344_v25, 2 }
  0xbd   : > { %v346_v27 = vadd.f32 %v345_v26, %v344_v25 }
  0xbe   : > { %v352_v28 = vpop.xlane.xlu0 %351 }
  0xbf   : > { %v353_v29 = vrot.slane %v352_v28, 4  ;;  %v347_v30 = vrot.slane %v346_v27, 1 }
  0xc1   : > { %v354_v31 = vadd.f32 %v353_v29, %v352_v28  ;;  %v348_v32 = vadd.f32 %v347_v30, %v346_v27 }
  0xc3   : > { %v355_v33 = vrot.slane %v354_v31, 2  ;;  %519 = vpush %v348_v32 }
  0xc5   : > { %v356_v34 = vadd.f32 %v355_v33, %v354_v31 }
  0xc7   : > { %v357_v35 = vrot.slane %v356_v34, 1 }
  0xc9   : > { %v358_v36 = vadd.f32 %v357_v35, %v356_v34 }
  0xcb   : > { %521 = vpush %v358_v36 }
  0xf4   : > { %s520_s4 = spop %519 }
  0xf5   : > { %v360_v37 = vstv %s520_s4 }
  0xf6   : > { %362 = vst.msk [vmem:[%s292_s30] sm:$0x1] %vm361_vm2, %v360_v37 }
  0xfc   : > { %s522_s8 = spop %521 }
  0xfd   : > { %v363_v38 = vstv %s522_s8 }
  0xfe   : > { %364 = vst.msk [vmem:[%s298_s7] sm:$0x1] %vm361_vm2, %v363_v38 }
  0xff PF: > { %s20_s17 = sadd.s32 1, %s703_s17   ;;  %s831_s12 = smov %s687_s13 }
 0x100   : > { %p17_p0 = scmp.ge.s32.totalorder %s20_s17, 4   ;;  %s832_s13 = smov %s691_s14 }
 0x101   : > { %s833_s14 = smov %s776_s24  ;;  %s834_s15 = smov %s699_s16 }
 0x102   : > { %s835_s16 = smov %s837_s19  ;;  %19 = sbr.rel (!%p17_p0) target bundleno = 6 (0x6), region = 101 }
 0x107   :  { %406 = vsyncpa [#allocation5], 1 }
 0x108   :  { %408 = vsyncpa [#allocation5 + $0x1], 1 }
 0x109   :  { %409 = vsyncpa [#allocation7], 1 }
 0x10a   :  { %411 = vsyncpa [#allocation7 + $0x1], 1 }

</bundles_post_ra>
